<compile_context>
chip_gen: v5e
topology: v5e:2x2
jax: 0.10.0
libtpu: 0.0.40
codegen_flags: <defaults>
</compile_context>

<pallas_src>
import functools

import jax
import jax.numpy as jnp
from jax.experimental import pallas as pl
from jax.experimental.pallas import tpu as pltpu

LOG_SIG_MAX = 2.0
LOG_SIG_MIN = -20.0


def _round_up(x, m):
    return ((x + m - 1) // m) * m


def _policy_kernel(obs_ref, prefs_ref, w_ref, b_ref, mean_ref, logstd_ref, *,
                   obs_dim, reward_dim, h1, h2, out_dim, row_off):
    """Fused 2-layer MLP + combined mean|log_std head, all in VMEM."""
    r1, r2, r3 = row_off
    obs = obs_ref[...]
    prefs = prefs_ref[...]

    # Layer 1: concat(obs, prefs) @ W1 folded into two dots on the split weight.
    h = (jnp.dot(obs, w_ref[r1:r1 + obs_dim, 0:h1],
                 preferred_element_type=jnp.float32)
         + jnp.dot(prefs, w_ref[r1 + obs_dim:r1 + obs_dim + reward_dim, 0:h1],
                   preferred_element_type=jnp.float32)
         + b_ref[:, 0:h1])
    h = jnp.maximum(h, 0.0)

    # Layer 2.
    h = (jnp.dot(h, w_ref[r2:r2 + h1, 0:h2],
                 preferred_element_type=jnp.float32)
         + b_ref[:, h1:h1 + h2])
    h = jnp.maximum(h, 0.0)

    # Fused mean|log_std head: one matmul, split on store.
    heads = (jnp.dot(h, w_ref[r3:r3 + h2, 0:2 * out_dim],
                     preferred_element_type=jnp.float32)
             + b_ref[:, h1 + h2:h1 + h2 + 2 * out_dim])
    mean_ref[...] = heads[:, 0:out_dim]
    logstd_ref[...] = jnp.clip(heads[:, out_dim:2 * out_dim],
                               LOG_SIG_MIN, LOG_SIG_MAX)


def pack_params(params, obs_dim, reward_dim, out_dim):
    """One-time packing of all weights/biases into two VMEM slabs.

    Weight slab rows are padded per-segment to a multiple of 8 so every
    in-kernel static slice starts on a sublane boundary.
    """
    w1, b1 = params["w1"], params["b1"]
    w2, b2 = params["w2"], params["b2"]
    w_head = jnp.concatenate([params["wm"], params["ws"]], axis=1)  # [h2, 2*out]
    b_head = jnp.concatenate([params["bm"], params["bs"]], axis=1)  # [1, 2*out]

    d_in = obs_dim + reward_dim
    h1 = w1.shape[1]
    h2 = w2.shape[1]
    width = max(h1, h2, 2 * out_dim)

    def place(w):
        rows = _round_up(w.shape[0], 8)
        return jnp.pad(w, ((0, rows - w.shape[0]), (0, width - w.shape[1])))

    w_slab = jnp.concatenate([place(w1), place(w2), place(w_head)], axis=0)
    b_slab = jnp.concatenate([b1, b2, b_head], axis=1)
    row_off = (0,
               _round_up(d_in, 8),
               _round_up(d_in, 8) + _round_up(h1, 8))
    dims = (obs_dim, reward_dim, h1, h2, out_dim)
    return w_slab, b_slab, row_off, dims


def gaussian_policy_forward(obs, prefs, w_slab, b_slab, *, dims, row_off,
                            block_batch=512):
    """Run the fused policy kernel.  obs [B, obs_dim], prefs [B, reward_dim]."""
    obs_dim, reward_dim, h1, h2, out_dim = dims
    batch = obs.shape[0]
    # Full batch as one block when small; otherwise 8-aligned tiles streamed
    # over a parallel grid (weights stay resident via block index (0, 0)).
    tb = batch if batch <= block_batch else block_batch
    grid = (pl.cdiv(batch, tb),)

    kernel = functools.partial(_policy_kernel,
                               obs_dim=obs_dim, reward_dim=reward_dim,
                               h1=h1, h2=h2, out_dim=out_dim, row_off=row_off)

    w_rows, w_cols = w_slab.shape
    b_cols = b_slab.shape[1]

    mean, log_std = pl.pallas_call(
        kernel,
        out_shape=(jax.ShapeDtypeStruct((batch, out_dim), jnp.float32),
                   jax.ShapeDtypeStruct((batch, out_dim), jnp.float32)),
        grid=grid,
        in_specs=[
            pl.BlockSpec((tb, obs_dim), lambda i: (i, 0)),
            pl.BlockSpec((tb, reward_dim), lambda i: (i, 0)),
            pl.BlockSpec((w_rows, w_cols), lambda i: (0, 0)),   # resident weights
            pl.BlockSpec((1, b_cols), lambda i: (0, 0)),        # resident biases
        ],
        out_specs=(
            pl.BlockSpec((tb, out_dim), lambda i: (i, 0)),
            pl.BlockSpec((tb, out_dim), lambda i: (i, 0)),
        ),
        compiler_params=pltpu.CompilerParams(
            dimension_semantics=("parallel",)),
    )(obs, prefs, w_slab, b_slab)
    return mean, log_std


def init_params(key, input_dim, layer_features, output_dim):
    """Deterministic synthetic init (uniform fan-in scaling, like nn.Linear)."""
    dims = [input_dim] + list(layer_features)
    keys = jax.random.split(key, 2 * (len(layer_features) + 2))
    params = {}

    def linear(kw, kb, fan_in, fan_out):
        bound = 1.0 / jnp.sqrt(fan_in)
        w = jax.random.uniform(kw, (fan_in, fan_out), jnp.float32, -bound, bound)
        b = jax.random.uniform(kb, (1, fan_out), jnp.float32, -bound, bound)
        return w, b

    # two hidden layers of the latent MLP
    params["w1"], params["b1"] = linear(keys[0], keys[1], dims[0], dims[1])
    params["w2"], params["b2"] = linear(keys[2], keys[3], dims[1], dims[2])
    # mean / log_std heads
    params["wm"], params["bm"] = linear(keys[4], keys[5], dims[2], output_dim)
    params["ws"], params["bs"] = linear(keys[6], keys[7], dims[2], output_dim)
    return params


if __name__ == "__main__":
    # Config consistent with PolicyConfig: obs_dim=16, reward_dim=4,
    # layer_features=(32, 32), output_dim=8, batch=8.
    batch, obs_dim, reward_dim = 8, 16, 4
    layer_features = (32, 32)
    output_dim = 8

    key = jax.random.PRNGKey(0)
    k_obs, k_prefs, k_params = jax.random.split(key, 3)

    obs = jax.random.normal(k_obs, (batch, obs_dim), jnp.float32)
    prefs = jax.random.uniform(k_prefs, (batch, reward_dim), jnp.float32)
    params = init_params(k_params, obs_dim + reward_dim, layer_features, output_dim)

    # One-time parameter packing (outside the per-call path).
    w_slab, b_slab, row_off, dims = pack_params(params, obs_dim, reward_dim, output_dim)
    w_slab, b_slab = jax.device_put(w_slab), jax.device_put(b_slab)

    fwd = jax.jit(functools.partial(gaussian_policy_forward,
                                    dims=dims, row_off=row_off))
    mean, log_std = fwd(obs, prefs, w_slab, b_slab)
    jax.block_until_ready((mean, log_std))

    # Pure-JAX reference check of the same semantics (unpacked params).
    x = jnp.concatenate([obs, prefs], axis=-1)
    h = jnp.maximum(x @ params["w1"] + params["b1"], 0.0)
    h = jnp.maximum(h @ params["w2"] + params["b2"], 0.0)
    ref_mean = h @ params["wm"] + params["bm"]
    ref_log_std = jnp.clip(h @ params["ws"] + params["bs"], LOG_SIG_MIN, LOG_SIG_MAX)
    assert jnp.allclose(mean, ref_mean, atol=1e-5), "mean mismatch"
    assert jnp.allclose(log_std, ref_log_std, atol=1e-5), "log_std mismatch"
    assert mean.shape == (batch, output_dim) and log_std.shape == (batch, output_dim)

    # TODO(synk): sample_action / take_action (tanh squash + Normal sampling)
    # are not part of forward() and are left to the caller in plain JAX.

    print("KERNEL_OK")
</pallas_src>

<mosaic_0001>
module attributes {stable_mosaic.version = 11 : i64} {
  func.func @_policy_kernel(%arg0: i32, %arg1: memref<8x16xf32, #tpu.memory_space<vmem>>, %arg2: memref<8x4xf32, #tpu.memory_space<vmem>>, %arg3: memref<88x32xf32, #tpu.memory_space<vmem>>, %arg4: memref<1x80xf32, #tpu.memory_space<vmem>>, %arg5: memref<8x8xf32, #tpu.memory_space<vmem>>, %arg6: memref<8x8xf32, #tpu.memory_space<vmem>>) attributes {dimension_semantics = [#tpu.dimension_semantics<parallel>], iteration_bounds = array<i64: 1>, scalar_prefetch = 0 : i64, scratch_operands = 0 : i64, tpu.core_type = #tpu.core_type<tc>, window_params = [{transform_indices = @transform_0, window_bounds = array<i64: 8, 16>}, {transform_indices = @transform_1, window_bounds = array<i64: 8, 4>}, {pipeline_mode = #tpu.pipeline_mode<synchronous>, transform_indices = @transform_2, window_bounds = array<i64: 88, 32>}, {pipeline_mode = #tpu.pipeline_mode<synchronous>, transform_indices = @transform_3, window_bounds = array<i64: 1, 80>}, {transform_indices = @transform_4, window_bounds = array<i64: 8, 8>}, {transform_indices = @transform_5, window_bounds = array<i64: 8, 8>}]} {
    %c0 = arith.constant 0 : index
    %c0_0 = arith.constant 0 : index
    %0 = vector.load %arg1[%c0, %c0_0] : memref<8x16xf32, #tpu.memory_space<vmem>>, vector<8x16xf32>
    %c0_1 = arith.constant 0 : index
    %c0_2 = arith.constant 0 : index
    %1 = vector.load %arg2[%c0_1, %c0_2] : memref<8x4xf32, #tpu.memory_space<vmem>>, vector<8x4xf32>
    %c0_3 = arith.constant 0 : index
    %c0_4 = arith.constant 0 : index
    %2 = vector.load %arg3[%c0_3, %c0_4] : memref<88x32xf32, #tpu.memory_space<vmem>>, vector<16x32xf32>
    %cst = arith.constant dense<0.000000e+00> : vector<8x32xf32>
    %3 = tpu.matmul %0, %2, %cst {dimension_numbers = #tpu.dot_dimension_numbers<[1], [0], [0], [1], [0, 0, 1, 1], [], []>} : vector<8x16xf32>, vector<16x32xf32>, vector<8x32xf32> -> vector<8x32xf32>
    %c16 = arith.constant 16 : index
    %c0_5 = arith.constant 0 : index
    %4 = vector.load %arg3[%c16, %c0_5] : memref<88x32xf32, #tpu.memory_space<vmem>>, vector<4x32xf32>
    %cst_6 = arith.constant dense<0.000000e+00> : vector<8x32xf32>
    %5 = tpu.matmul %1, %4, %cst_6 {dimension_numbers = #tpu.dot_dimension_numbers<[1], [0], [0], [1], [0, 0, 1, 1], [], []>} : vector<8x4xf32>, vector<4x32xf32>, vector<8x32xf32> -> vector<8x32xf32>
    %6 = arith.addf %3, %5 : vector<8x32xf32>
    %c0_7 = arith.constant 0 : index
    %c0_8 = arith.constant 0 : index
    %7 = vector.load %arg4[%c0_7, %c0_8] : memref<1x80xf32, #tpu.memory_space<vmem>>, vector<1x32xf32>
    %8 = vector.broadcast %7 : vector<1x32xf32> to vector<8x32xf32>
    %9 = arith.addf %6, %8 : vector<8x32xf32>
    %cst_9 = arith.constant 0.000000e+00 : f32
    %10 = vector.broadcast %cst_9 : f32 to vector<8x32xf32>
    %11 = arith.maximumf %9, %10 : vector<8x32xf32>
    %c24 = arith.constant 24 : index
    %c0_10 = arith.constant 0 : index
    %12 = vector.load %arg3[%c24, %c0_10] : memref<88x32xf32, #tpu.memory_space<vmem>>, vector<32x32xf32>
    %cst_11 = arith.constant dense<0.000000e+00> : vector<8x32xf32>
    %13 = tpu.matmul %11, %12, %cst_11 {dimension_numbers = #tpu.dot_dimension_numbers<[1], [0], [0], [1], [0, 0, 1, 1], [], []>} : vector<8x32xf32>, vector<32x32xf32>, vector<8x32xf32> -> vector<8x32xf32>
    %c0_12 = arith.constant 0 : index
    %c32 = arith.constant 32 : index
    %14 = vector.load %arg4[%c0_12, %c32] : memref<1x80xf32, #tpu.memory_space<vmem>>, vector<1x32xf32>
    %15 = vector.broadcast %14 : vector<1x32xf32> to vector<8x32xf32>
    %16 = arith.addf %13, %15 : vector<8x32xf32>
    %cst_13 = arith.constant 0.000000e+00 : f32
    %17 = vector.broadcast %cst_13 : f32 to vector<8x32xf32>
    %18 = arith.maximumf %16, %17 : vector<8x32xf32>
    %c56 = arith.constant 56 : index
    %c0_14 = arith.constant 0 : index
    %19 = vector.load %arg3[%c56, %c0_14] : memref<88x32xf32, #tpu.memory_space<vmem>>, vector<32x16xf32>
    %cst_15 = arith.constant dense<0.000000e+00> : vector<8x16xf32>
    %20 = tpu.matmul %18, %19, %cst_15 {dimension_numbers = #tpu.dot_dimension_numbers<[1], [0], [0], [1], [0, 0, 1, 1], [], []>} : vector<8x32xf32>, vector<32x16xf32>, vector<8x16xf32> -> vector<8x16xf32>
    %c0_16 = arith.constant 0 : index
    %c64 = arith.constant 64 : index
    %21 = vector.load %arg4[%c0_16, %c64] : memref<1x80xf32, #tpu.memory_space<vmem>>, vector<1x16xf32>
    %22 = vector.broadcast %21 : vector<1x16xf32> to vector<8x16xf32>
    %23 = arith.addf %20, %22 : vector<8x16xf32>
    %24 = vector.extract_strided_slice %23 {offsets = [0, 0], sizes = [8, 8], strides = [1, 1]} : vector<8x16xf32> to vector<8x8xf32>
    %c0_17 = arith.constant 0 : index
    %c0_18 = arith.constant 0 : index
    %25 = vector.load %arg5[%c0_17, %c0_18] : memref<8x8xf32, #tpu.memory_space<vmem>>, vector<8x8xf32>
    tpu.vector_store %arg5[%c0_17, %c0_18], %24 {strides = array<i32>} : memref<8x8xf32, #tpu.memory_space<vmem>>, vector<8x8xf32>,
    %26 = vector.extract_strided_slice %23 {offsets = [0, 8], sizes = [8, 8], strides = [1, 1]} : vector<8x16xf32> to vector<8x8xf32>
    %cst_19 = arith.constant -2.000000e+01 : f32
    %cst_20 = arith.constant 2.000000e+00 : f32
    %27 = vector.broadcast %cst_19 : f32 to vector<8x8xf32>
    %28 = arith.maximumf %27, %26 : vector<8x8xf32>
    %29 = vector.broadcast %cst_20 : f32 to vector<8x8xf32>
    %30 = arith.minimumf %29, %28 : vector<8x8xf32>
    %c0_21 = arith.constant 0 : index
    %c0_22 = arith.constant 0 : index
    %31 = vector.load %arg6[%c0_21, %c0_22] : memref<8x8xf32, #tpu.memory_space<vmem>>, vector<8x8xf32>
    tpu.vector_store %arg6[%c0_21, %c0_22], %30 {strides = array<i32>} : memref<8x8xf32, #tpu.memory_space<vmem>>, vector<8x8xf32>,
    return
  }
  func.func @transform_0(%arg0: i32) -> (i32, i32) {
    %c0_i32 = arith.constant 0 : i32
    %c0_i32_0 = arith.constant 0 : i32
    return %arg0, %c0_i32 : i32, i32
  }
  func.func @transform_1(%arg0: i32) -> (i32, i32) {
    %c0_i32 = arith.constant 0 : i32
    %c0_i32_0 = arith.constant 0 : i32
    return %arg0, %c0_i32 : i32, i32
  }
  func.func @transform_2(%arg0: i32) -> (i32, i32) {
    %c0_i32 = arith.constant 0 : i32
    %c0_i32_0 = arith.constant 0 : i32
    %c0_i32_1 = arith.constant 0 : i32
    return %c0_i32, %c0_i32_0 : i32, i32
  }
  func.func @transform_3(%arg0: i32) -> (i32, i32) {
    %c0_i32 = arith.constant 0 : i32
    %c0_i32_0 = arith.constant 0 : i32
    %c0_i32_1 = arith.constant 0 : i32
    return %c0_i32, %c0_i32_0 : i32, i32
  }
  func.func @transform_4(%arg0: i32) -> (i32, i32) {
    %c0_i32 = arith.constant 0 : i32
    %c0_i32_0 = arith.constant 0 : i32
    return %arg0, %c0_i32 : i32, i32
  }
  func.func @transform_5(%arg0: i32) -> (i32, i32) {
    %c0_i32 = arith.constant 0 : i32
    %c0_i32_0 = arith.constant 0 : i32
    return %arg0, %c0_i32 : i32, i32
  }
}

</mosaic_0001>

<bundles_post_ra>
// kernel: gaussian_policy_forward.1
= control target key start
LH: loop header
LB: loop body
LE: loop exit
PB: predicated region body
PF: predicated region fallthrough
CT: control target
= control target key end

     0   :  { %11 = vsyncpa [#allocation3], 0  ;;  %vm30_vm0 = vcmask 1043456   ;;  %vm26_vm1 = vcmask 31744   ;;  %vm54_vm2 = vcmask 130048   ;;  %s335_s0 = inlined_call_operand.vmem [shape: f32[8,16], index: 0, kind: input, shape index: {}]   ;;  %s336_s1 = inlined_call_operand.vmem [shape: f32[8,4], index: 1, kind: input, shape index: {}]   ;;  %s337_s2 = inlined_call_operand.vmem [shape: f32[88,32], index: 2, kind: input, shape index: {}]   ;;  %s338_s3 = inlined_call_operand.vmem [shape: f32[1,80], index: 3, kind: input, shape index: {}]   ;;  %s339_s4 = inlined_call_operand.hbm [shape: f32[8,8], index: 4, kind: output, shape index: {0}]   ;;  %s340_s5 = inlined_call_operand.hbm [shape: f32[8,8], index: 5, kind: output, shape index: {1}]  }
   0x1   :  { %v24_v0 = vld [vmem:[%s337_s2 + $0x8] sm:$0xff]  ;;  %v25_v1 = vld [vmem:[%s337_s2 + $0x10] sm:$0xf]  ;;  %v23_v2 = vld [vmem:[%s337_s2] sm:$0xff] }
   0x2   :  { %72 = vmatpush.msra.mxu1 %v24_v0  ;;  %187 = vmatpush.msk.msra.mxu0 %vm30_vm0, %v25_v1  ;;  %v22_v3 = vld [vmem:[%s336_s1] sm:$0xff] }
   0x3   :  { %v21_v4 = vld [vmem:[%s335_s0] sm:$0xff]  ;;  %188 = vmatmul.msk.f32.vlgmr.msra.gmra.mxu0 %vm26_vm1, %v22_v3 }
   0x4   :  { %12 = vsyncpa [#allocation5], 0  ;;  %73 = vmatpush.msra.mxu1 %v23_v2  ;;  %v87_v5 = vld [vmem:[%s337_s2 + $0x30] sm:$0xff]  ;;  %v197_v6 = vld [vmem:[%s338_s3] ss:$0 sm:$0xff]  ;;  %s250_s9 = smov 96  }
   0x5   :  { %189 = vmatmul.msk.f32.vlgmr.msra.gmra.mxu1 %vm54_vm2, %v21_v4  ;;  %107 = vmatpush.msra.mxu2 %v87_v5  ;;  %v86_v7 = vld [vmem:[%s337_s2 + $0x28] sm:$0xff]  ;;  %v85_v8 = vld [vmem:[%s337_s2 + $0x20] sm:$0xff]  ;;  %v84_v9 = vld [vmem:[%s337_s2 + $0x18] sm:$0xff]  ;;  %vm91_vm3 = vcmask 261120   ;;  %s251_s15 = smov 64   ;;  %s252_s20 = smov [#allocation2]  }
   0x6   :  { %88 = vrot.lane.b32.xlu0 %v197_v6, %s250_s9  ;;  %v119_v10 = vld [vmem:[%s337_s2 + $0x50] sm:$0xff]  ;;  %v118_v11 = vld [vmem:[%s337_s2 + $0x48] sm:$0xff]  ;;  %v117_v17 = vld [vmem:[%s337_s2 + $0x40] sm:$0xff]  ;;  %s160_s21 = sshll.u32 %s252_s20, 4  ;;  %s162_s24 = sshll.u32 %s339_s4, 4  ;;  %vm146_vm4 = vcmask 64512   ;;  %s161_s21 = int_to_ptr.vmem [resolvable:$true] %s160_s21  ;;  %s163_s24 = int_to_ptr.hbm [resolvable:$true] %s162_s24 }
   0x7   :  { %108 = vmatpush.msra.mxu2 %v86_v7  ;;  %138 = vmatpush.msra.mxu3 %v119_v10  ;;  %v116_v18 = vld [vmem:[%s337_s2 + $0x38] sm:$0xff]  ;;  %s253_s2 = smov 120   ;;  %s254_s25 = smov [#allocation4]  }
   0x8   :  { %s171_s26 = sshll.u32 %s254_s25, 4  ;;  %s173_s29 = sshll.u32 %s340_s5, 4  ;;  %s172_s26 = int_to_ptr.vmem [resolvable:$true] %s171_s26  ;;  %s174_s29 = int_to_ptr.hbm [resolvable:$true] %s173_s29 }
   0x9   :  { %109 = vmatpush.msra.mxu2 %v85_v8  ;;  %139 = vmatpush.msra.mxu3 %v118_v11 }
   0xb   :  { %110 = vmatpush.msra.mxu2 %v84_v9  ;;  %140 = vmatpush.msra.mxu3 %v117_v17 }
   0xd   :  { %141 = vmatpush.msra.mxu3 %v116_v18 }
   0xe   :  { %120 = vrot.lane.b32.xlu0 %v197_v6, %s251_s15 }
  0x78   :  { %v89_v19 = vpop.permute.xlu0 %88 }
  0x80   :  { %v51_v12 = vpop.f32.mrf.mxu0  ;;  %v121_v23 = vpop.permute.xlu0 %120 }
  0x82   :  { %v75_v13 = vpop.f32.mrf.mxu1 }
  0x83   :  { %v76_v14 = vadd.f32 %v75_v13, %v51_v12 }
  0x85   :  { %v82_v15 = vadd.f32 %v197_v6, %v76_v14 }
  0x87   :  { %v83_v16 = vmax.f32 %v82_v15, 0.0 }
  0x89   :  { %190 = vmatmul.msk.f32.vlgmr.msra.gmra.mxu2 %vm91_vm3, %v83_v16 }
 0x10c   :  { %v112_v20 = vpop.f32.mrf.mxu2 }
 0x10d   :  { %v113_v21 = vadd.f32 %v112_v20, %v89_v19 }
 0x10f   :  { %v115_v22 = vmax.f32 %v113_v21, 0.0 }
 0x111   :  { %191 = vmatmul.msk.f32.vlgmr.msra.gmra.mxu3 %vm91_vm3, %v115_v22 }
 0x194   :  { %v143_v24 = vpop.f32.mrf.mxu3 }
 0x195   :  { %v144_v25 = vadd.f32 %v143_v24, %v121_v23 }
 0x197   :  { %v148_v26 = vmax.f32 %v144_v25, -20.0  ;;  %147 = vst.msk [vmem:[#allocation2] sm:$0xff] %vm146_vm4, %v144_v25 }
 0x198   :  { %165 = dma.vmem_to_hbm [thread:$0]  %s161_s21, 128, %s163_s24, [#allocation3]  }
 0x199   :  { %v149_v27 = vmin.f32 %v148_v26, 2.0 }
 0x19b   :  { %151 = vrot.lane.b32.xlu1 %v149_v27, %s253_s2 }
 0x20d   :  { %v152_v28 = vpop.permute.xlu1 %151 }
 0x20e   :  { %154 = vst.msk [vmem:[#allocation4] sm:$0xff] %vm146_vm4, %v152_v28 }
 0x20f   :  { %176 = dma.vmem_to_hbm [thread:$0]  %s172_s26, 128, %s174_s29, [#allocation5]  }
 0x210   :  { %246 = dma.done.wait [#allocation3], 128  }
 0x211   :  { %247 = vsyncadd [#allocation3], 4294967168 }
 0x212   :  { %248 = dma.done.wait [#allocation5], 128  }
 0x213   :  { %249 = vsyncadd [#allocation5], 4294967168 }
 0x214   :  { %185 = vsyncpa [#allocation3], 1 }
 0x215   :  { %186 = vsyncpa [#allocation5], 1 }

</bundles_post_ra>
